<compile_context>
chip_gen: v6e
topology: v6e:2x2x1
jax: 0.10.0
libtpu: 0.0.40
codegen_flags: <defaults>
</compile_context>

<pallas_src>
import jax
import jax.numpy as jnp
from jax.experimental import pallas as pl
from jax.experimental.pallas import tpu as pltpu


def _round_up(x: int, m: int) -> int:
    return ((x + m - 1) // m) * m


def mlp_kernel(x_ref, w1_ref, b1_ref, w2_ref, b2_ref, o_ref):
    # x arrives f32; cast to bf16 on the VPU for the MXU (accumulate in f32).
    x_bf = x_ref[...].astype(jnp.bfloat16)
    h = jnp.dot(x_bf, w1_ref[...], preferred_element_type=jnp.float32)
    # Bias add + ReLU in f32 (v5e has no bf16 VPU).
    h = jnp.maximum(h + b1_ref[...], 0.0)
    # Intentional precision loss: h is truncated to bf16 for the second MXU pass
    # (end-to-end error ~1e-2 relative vs the f32 PyTorch reference).
    y = jnp.dot(h.astype(jnp.bfloat16), w2_ref[...],
                preferred_element_type=jnp.float32)
    o_ref[...] = (y + b2_ref[...]).astype(o_ref.dtype)


def prepare_params(w1, b1, w2, b2):
    """One-time parameter prep (hoisted out of the per-call path).

    Casts MXU operands to bf16 and reshapes biases to (1, features) f32.
    """
    return (w1.astype(jnp.bfloat16),
            jnp.asarray(b1, jnp.float32).reshape(1, -1),
            w2.astype(jnp.bfloat16),
            jnp.asarray(b2, jnp.float32).reshape(1, -1))


def mlp_forward(x, w1_bf, b1, w2_bf, b2, *, tb=1024):
    """relu(x @ w1 + b1) @ w2 + b2, tiled over the batch dimension.

    x:            (B, 20) float32
    w1_bf/w2_bf:  bf16 weights from prepare_params()
    b1/b2:        (1, hid) / (1, out) float32 biases from prepare_params()
    tb:           max batch tile (rows per grid step).
    """
    B, in_f = x.shape
    hid = w1_bf.shape[1]
    out_f = w2_bf.shape[1]

    # Tile size: multiple of 8 sublanes, never bigger than the (8-rounded) batch.
    tb = _round_up(min(tb, max(B, 8)), 8)
    if B <= tb and B > 8:
        # Single grid step would idle one TensorCore on v7x: split into ~2 steps.
        tb = _round_up(pl.cdiv(B, 2), 8)
    grid = (pl.cdiv(B, tb),)   # ragged last block handled by Pallas (masked stores)

    cost = pl.CostEstimate(
        flops=2 * B * (in_f * hid + hid * out_f),
        bytes_accessed=(x.size * 4 + w1_bf.size * 2 + w2_bf.size * 2
                        + b1.size * 4 + b2.size * 4 + B * out_f * 4),
        transcendentals=0,
    )

    return pl.pallas_call(
        mlp_kernel,
        out_shape=jax.ShapeDtypeStruct((B, out_f), jnp.float32),
        grid_spec=pltpu.PrefetchScalarGridSpec(
            num_scalar_prefetch=0,
            grid=grid,
            in_specs=[
                # X: one f32 batch tile per grid step (auto double-buffered pipeline).
                pl.BlockSpec((tb, in_f), lambda i: (i, 0)),
                # Weights/biases: constant block index -> fetched once, VMEM-resident.
                pl.BlockSpec((in_f, hid), lambda i: (0, 0)),
                pl.BlockSpec((1, hid), lambda i: (0, 0)),
                pl.BlockSpec((hid, out_f), lambda i: (0, 0)),
                pl.BlockSpec((1, out_f), lambda i: (0, 0)),
            ],
            # Narrow (tb, 10) block: legal since 10 == full output feature dim; the tiny
            # masked store beats a 128-lane-padded f32 writeback by ~12.8x in HBM bytes.
            out_specs=pl.BlockSpec((tb, out_f), lambda i: (i, 0)),
        ),
        compiler_params=pltpu.CompilerParams(
            # Batch tiles are independent: shard across both TensorCores on v7x.
            dimension_semantics=("parallel",),
        ),
        cost_estimate=cost,
    )(x, w1_bf, b1, w2_bf, b2)


def init_params(key, in_f=20, hid=256, out_f=10, dtype=jnp.float32):
    # Deterministic init mimicking PyTorch nn.Linear default:
    # U(-1/sqrt(fan_in), 1/sqrt(fan_in)) for weights and biases.
    k1, k2, k3, k4 = jax.random.split(key, 4)
    lim1 = 1.0 / (in_f ** 0.5)
    lim2 = 1.0 / (hid ** 0.5)
    w1 = jax.random.uniform(k1, (in_f, hid), dtype, minval=-lim1, maxval=lim1)
    b1 = jax.random.uniform(k2, (1, hid), dtype, minval=-lim1, maxval=lim1)
    w2 = jax.random.uniform(k3, (hid, out_f), dtype, minval=-lim2, maxval=lim2)
    b2 = jax.random.uniform(k4, (1, out_f), dtype, minval=-lim2, maxval=lim2)
    return w1, b1, w2, b2


if __name__ == "__main__":
    key = jax.random.PRNGKey(0)
    kx, kp = jax.random.split(key)

    # Small demo shapes: B=40 exercises a multi-step batch grid (tb clamps to 24,
    # grid=(2,)) plus a ragged last block (rows 24..39 real, 40..47 masked).
    B, IN, HID, OUT = 40, 20, 256, 10
    x = jax.random.normal(kx, (B, IN), jnp.float32)
    w1, b1, w2, b2 = init_params(kp, IN, HID, OUT)

    # One-time param prep (in production this lives at model init, not per call).
    w1_bf, b1_p, w2_bf, b2_p = prepare_params(w1, b1, w2, b2)

    out = mlp_forward(x, w1_bf, b1_p, w2_bf, b2_p)
    out = jax.block_until_ready(out)

    # Pure-JAX f32 reference (same semantics as the PyTorch forward).
    # Tolerance loosened vs pure f32 because MXU operands (x, h, weights) are bf16.
    ref = jnp.maximum(x @ w1 + b1, 0.0) @ w2 + b2
    assert out.shape == (B, OUT)
    assert jnp.allclose(out, ref, atol=3e-2, rtol=3e-2), (
        float(jnp.max(jnp.abs(out - ref))))

    print("KERNEL_OK")
</pallas_src>

<mosaic_0001>
module attributes {stable_mosaic.version = 11 : i64} {
  func.func @mlp_kernel(%arg0: i32, %arg1: memref<24x20xf32, #tpu.memory_space<vmem>>, %arg2: memref<20x256xbf16, #tpu.memory_space<vmem>>, %arg3: memref<1x256xf32, #tpu.memory_space<vmem>>, %arg4: memref<256x10xbf16, #tpu.memory_space<vmem>>, %arg5: memref<1x10xf32, #tpu.memory_space<vmem>>, %arg6: memref<24x10xf32, #tpu.memory_space<vmem>>) attributes {dimension_semantics = [#tpu.dimension_semantics<parallel>], iteration_bounds = array<i64: 2>, scalar_prefetch = 0 : i64, scratch_operands = 0 : i64, tpu.core_type = #tpu.core_type<tc>, window_params = [{transform_indices = @transform_0, window_bounds = array<i64: 24, 20>}, {pipeline_mode = #tpu.pipeline_mode<synchronous>, transform_indices = @transform_1, window_bounds = array<i64: 20, 256>}, {pipeline_mode = #tpu.pipeline_mode<synchronous>, transform_indices = @transform_2, window_bounds = array<i64: 1, 256>}, {pipeline_mode = #tpu.pipeline_mode<synchronous>, transform_indices = @transform_3, window_bounds = array<i64: 256, 10>}, {pipeline_mode = #tpu.pipeline_mode<synchronous>, transform_indices = @transform_4, window_bounds = array<i64: 1, 10>}, {transform_indices = @transform_5, window_bounds = array<i64: 24, 10>}]} {
    %c0 = arith.constant 0 : index
    %c0_0 = arith.constant 0 : index
    %0 = vector.load %arg1[%c0, %c0_0] : memref<24x20xf32, #tpu.memory_space<vmem>>, vector<24x20xf32>
    %1 = arith.truncf %0 : vector<24x20xf32> to vector<24x20xbf16>
    %c0_1 = arith.constant 0 : index
    %c0_2 = arith.constant 0 : index
    %2 = vector.load %arg2[%c0_1, %c0_2] : memref<20x256xbf16, #tpu.memory_space<vmem>>, vector<20x256xbf16>
    %cst = arith.constant dense<0.000000e+00> : vector<24x256xf32>
    %3 = tpu.matmul %1, %2, %cst {dimension_numbers = #tpu.dot_dimension_numbers<[1], [0], [0], [1], [0, 0, 1, 1], [], []>} : vector<24x20xbf16>, vector<20x256xbf16>, vector<24x256xf32> -> vector<24x256xf32>
    %c0_3 = arith.constant 0 : index
    %c0_4 = arith.constant 0 : index
    %4 = vector.load %arg3[%c0_3, %c0_4] : memref<1x256xf32, #tpu.memory_space<vmem>>, vector<1x256xf32>
    %5 = vector.broadcast %4 : vector<1x256xf32> to vector<24x256xf32>
    %6 = arith.addf %3, %5 : vector<24x256xf32>
    %cst_5 = arith.constant 0.000000e+00 : f32
    %7 = vector.broadcast %cst_5 : f32 to vector<24x256xf32>
    %8 = arith.maximumf %6, %7 : vector<24x256xf32>
    %9 = arith.truncf %8 : vector<24x256xf32> to vector<24x256xbf16>
    %c0_6 = arith.constant 0 : index
    %c0_7 = arith.constant 0 : index
    %10 = vector.load %arg4[%c0_6, %c0_7] : memref<256x10xbf16, #tpu.memory_space<vmem>>, vector<256x10xbf16>
    %cst_8 = arith.constant dense<0.000000e+00> : vector<24x10xf32>
    %11 = tpu.matmul %9, %10, %cst_8 {dimension_numbers = #tpu.dot_dimension_numbers<[1], [0], [0], [1], [0, 0, 1, 1], [], []>} : vector<24x256xbf16>, vector<256x10xbf16>, vector<24x10xf32> -> vector<24x10xf32>
    %c0_9 = arith.constant 0 : index
    %c0_10 = arith.constant 0 : index
    %12 = vector.load %arg5[%c0_9, %c0_10] : memref<1x10xf32, #tpu.memory_space<vmem>>, vector<1x10xf32>
    %13 = vector.broadcast %12 : vector<1x10xf32> to vector<24x10xf32>
    %14 = arith.addf %11, %13 : vector<24x10xf32>
    %c0_11 = arith.constant 0 : index
    %c0_12 = arith.constant 0 : index
    %15 = vector.load %arg6[%c0_11, %c0_12] : memref<24x10xf32, #tpu.memory_space<vmem>>, vector<24x10xf32>
    tpu.vector_store %arg6[%c0_11, %c0_12], %14 {strides = array<i32>} : memref<24x10xf32, #tpu.memory_space<vmem>>, vector<24x10xf32>,
    return
  }
  func.func @transform_0(%arg0: i32) -> (i32, i32) {
    %c0_i32 = arith.constant 0 : i32
    %c0_i32_0 = arith.constant 0 : i32
    return %arg0, %c0_i32 : i32, i32
  }
  func.func @transform_1(%arg0: i32) -> (i32, i32) {
    %c0_i32 = arith.constant 0 : i32
    %c0_i32_0 = arith.constant 0 : i32
    %c0_i32_1 = arith.constant 0 : i32
    return %c0_i32, %c0_i32_0 : i32, i32
  }
  func.func @transform_2(%arg0: i32) -> (i32, i32) {
    %c0_i32 = arith.constant 0 : i32
    %c0_i32_0 = arith.constant 0 : i32
    %c0_i32_1 = arith.constant 0 : i32
    return %c0_i32, %c0_i32_0 : i32, i32
  }
  func.func @transform_3(%arg0: i32) -> (i32, i32) {
    %c0_i32 = arith.constant 0 : i32
    %c0_i32_0 = arith.constant 0 : i32
    %c0_i32_1 = arith.constant 0 : i32
    return %c0_i32, %c0_i32_0 : i32, i32
  }
  func.func @transform_4(%arg0: i32) -> (i32, i32) {
    %c0_i32 = arith.constant 0 : i32
    %c0_i32_0 = arith.constant 0 : i32
    %c0_i32_1 = arith.constant 0 : i32
    return %c0_i32, %c0_i32_0 : i32, i32
  }
  func.func @transform_5(%arg0: i32) -> (i32, i32) {
    %c0_i32 = arith.constant 0 : i32
    %c0_i32_0 = arith.constant 0 : i32
    return %arg0, %c0_i32 : i32, i32
  }
}

</mosaic_0001>

<bundles_post_ra>
// kernel: tpu_custom_call.1
= control target key start
LH: loop header
LB: loop body
LE: loop exit
PB: predicated region body
PF: predicated region fallthrough
CT: control target
= control target key end

     0   :  { %s1075_s18 = smov 0   ;;  %s1077_s19 = smov 0   ;;  %s1219_s0 = inlined_call_operand.vmem [shape: f32[40,20], index: 0, kind: input, shape index: {}]   ;;  %s1220_s1 = inlined_call_operand.vmem [shape: bf16[20,256], index: 1, kind: input, shape index: {}]   ;;  %s1221_s2 = inlined_call_operand.vmem [shape: f32[1,256], index: 2, kind: input, shape index: {}]   ;;  %s1222_s3 = inlined_call_operand.vmem [shape: bf16[256,10], index: 3, kind: input, shape index: {}]   ;;  %s1223_s4 = inlined_call_operand.vmem [shape: f32[1,10], index: 4, kind: input, shape index: {}]   ;;  %s1224_s5 = inlined_call_operand.vmem [shape: f32[40,10], index: 5, kind: output, shape index: {}]  }
   0x1   :  { %s1079_s20 = smov 0  }
   0x2 LB: > { %s1088_s21 = sadd.s32 4294967295, %s1010_s20   ;;  %s1090_s22 = sadd.s32 1, %s1010_s20   ;;  %s1010_s20 = sphi %s1079_s20, %s1228_s20   ;;  %s1006_s19 = sphi %s1077_s19, %s1227_s19   ;;  %s1002_s18 = sphi %s1075_s18, %s1226_s18  }
   0x3   : > { %s129_s23 = ssub.s32 %s1010_s20, %s1090_s22  ;;  %s132_s24 = sadd.s32 1, %s1006_s19 }
   0x4   : > { %p130_p0 = scmp.eq.s32.totalorder %s129_s23, 0  ;;  %p142_p1 = scmp.ne.s32.totalorder %s1006_s19, %s1002_s18 }
   0x5   : > { %p143_p2 = scmp.eq.s32.totalorder %s1088_s21, 1  ;;  %p773_p3 = scmp.ge.s32.totalorder %s1010_s20, 1 }
   0x6   : > { %s1098_s25 = scalar_select %p130_p0, %s1006_s19, %s132_s24  }
   0x7   : > { %p1100_p4 = por %p143_p2, %p142_p1  ;;  %p196_p5 = scmp.lt.s32.totalorder %s1010_s20, 3 }
   0x9   : > { %p197_p6 = pnand %p773_p3, %p196_p5 }
   0xa   : > { %s1111_s6 = smul.u32 (!%p197_p6), 3, %s1088_s21  ;;  %s224_s12 = sand.u32 (!%p197_p6), 1, %s1002_s18  }
   0xb   : > { %200 = sbr.rel (%p197_p6) target bundleno = 494 (0x1ee), region = 40 }
   0xc   : > { %p232_p7 = scmp.lt.s32.totalorder (!%p197_p6), %s1111_s6, 4 }
  0x10   : > { %v254_v0 = vld [vmem:[%s1220_s1 + $0x10] sm:$0x33]  ;;  %vm289_vm0 = vcmask 1041408   ;;  %v933_v3 = vld [vmem:[%s1220_s1 + $0x4] ss:$8 sps:$4 sm:$0xff]   ;;  %v1044_v4 = vmov 0   ;;  %v257_v28 = vlaneseq }
  0x11   : > { %v778_v1 = vcombine.high %v254_v0, %v254_v0  ;;  %v777_v2 = vcombine.low %v254_v0, %v254_v0  ;;  %328 = vmatprep.mubr.bf16.mxu0 %v1044_v4  ;;  %v935_v5 = vld [vmem:[%s1220_s1] ss:$8 sps:$4 sm:$0xff]   ;;  %v936_v6 = vld [vmem:[%s1222_s3 + $0x78] sm:$0xff]   ;;  %s233_s13 = scalar_select %p232_p7, %s1111_s6, 4  ;;  %v938_v9 = vld [vmem:[%s1222_s3 + $0x70] sm:$0xff]   ;;  %vm282_vm1 = vcmask 162816  }
  0x12   : > { %812 = vmatprep.subr.bf16.mxu1 %v936_v6  ;;  %v937_v8 = vld [vmem:[%s1222_s3 + $0x38] sm:$0xff]   ;;  %v939_v10 = vld [vmem:[%s1222_s3 + $0x30] sm:$0xff]   ;;  %v940_v11 = vld [vmem:[%s1222_s3 + $0x68] sm:$0xff]   ;;  %v258_v29 = vshrl.u32 %v257_v28, 7  ;;  %vm540_vm2 = vcmask 80896   ;;  %s552_s18 = ssub.s32 (%p1100_p4), 5, %s1111_s6 }
  0x13   : > { %779 = vmatprep.subr.msk.bf16.mxu0 %vm289_vm0, %v778_v1  ;;  %v291_v7 = vsel %vm289_vm0, %v777_v2, 0  ;;  %813 = vmatpush3.bf16.msra.mxu1 %v937_v8  ;;  %s774_s20 = sshll.u32 %s233_s13, 3  ;;  %v941_v15 = vld [vmem:[%s1222_s3 + $0x28] sm:$0xff]   ;;  %v942_v16 = vld [vmem:[%s1222_s3 + $0x60] sm:$0xff]   ;;  %v944_v19 = vld [vmem:[%s1222_s3 + $0x58] sm:$0xff]   ;;  %s840_s13 = smul.u32 24, %s224_s12 }
  0x14   : > { %309 = vmatpush1.bf16.msra.mxu0 %v291_v7  ;;  %814 = vmatprep.subr.bf16.mxu1 %v938_v9  ;;  %s235_s29 = scalar_lea.vmem %s1219_s0, %s774_s20  ;;  %v943_v18 = vld [vmem:[%s1222_s3 + $0x20] sm:$0xff]   ;;  %v945_v21 = vld [vmem:[%s1222_s3 + $0x18] sm:$0xff]   ;;  %v946_v22 = vld [vmem:[%s1222_s3 + $0x50] sm:$0xff]   ;;  %v263_v30 = vsub.s32 1, %v258_v29  ;;  %v259_v31 = vsub.s32 0, %v258_v29  ;;  %s811_s17 = smul.u32 (%p1100_p4), 24, %s1088_s21 }
  0x15   : > { %310 = vmatprep.subr.bf16.mxu0 %v933_v3  ;;  %v247_v12 = vld [vmem:[%s235_s29] sm:$0xff]  ;;  %v248_v13 = vld [vmem:[%s235_s29 + $0x8] sm:$0xff]  ;;  %v249_v17 = vld [vmem:[%s235_s29 + $0x10] sm:$0xff]  ;;  %s1178_s16 = scalar_lea.vmem [#allocation2], %s840_s13   ;;  %p553_p8 = scmp.lt.s32.totalorder (%p1100_p4), %s552_s18, 3 }
  0x16   : > { %v250_v14 = vpack.c.bf16 %v248_v13, %v247_v12  ;;  %v251_v20 = vpack.c.bf16 %v249_v17, %v249_v17  ;;  %v947_v23 = vld [vmem:[%s1222_s3 + $0x10] sm:$0xff]   ;;  %v948_v24 = vld [vmem:[%s1222_s3 + $0x48] sm:$0xff]   ;;  %v950_v26 = vld [vmem:[%s1222_s3 + $0x40] sm:$0xff]   ;;  %s1190_s24 = scalar_lea.vmem (%p1100_p4), %s1224_s5, %s811_s17  }
  0x17   : > { %815 = vmatpush3.bf16.msra.mxu1 %v939_v10  ;;  %v949_v25 = vld [vmem:[%s1222_s3 + $0x8] sm:$0xff]   ;;  %v951_v27 = vld [vmem:[%s1222_s3] sm:$0xff]  }
  0x18   : > { %311 = vmatpush1.bf16.msra.mxu0 %v935_v5  ;;  %816 = vmatprep.subr.bf16.mxu1 %v940_v11  ;;  %v255_v32 = vld [vmem:[%s1221_s2] sm:$0x3] }
  0x19   : > { %v264_v34 = vrot.slane %v255_v32, %v263_v30  ;;  %v260_v35 = vrot.slane %v255_v32, %v259_v31  ;;  %v782_v60 = vld [vmem:[%s1223_s4] ss:$0 sm:$0xff] }
  0x1b   : > { %780 = vmatmul.mubr.msk.bf16.vlgmr.msra.gmra.mxu0 %vm282_vm1, %v250_v14  ;;  %817 = vmatpush3.bf16.msra.mxu1 %v941_v15 }
  0x1c   : > { %338 = vmatprep.mubr.bf16.mxu0 %v1044_v4  ;;  %818 = vmatprep.subr.bf16.mxu1 %v942_v16 }
  0x1f   : > { %819 = vmatpush3.bf16.msra.mxu1 %v943_v18 }
  0x20   : > { %820 = vmatprep.subr.bf16.mxu1 %v944_v19 }
  0x23   : > { %781 = vmatmul.mubr.msk.bf16.gmra.mxu0 %vm282_vm1, %v251_v20  ;;  %821 = vmatpush3.bf16.msra.mxu1 %v945_v21 }
  0x24   : > { %822 = vmatprep.subr.bf16.mxu1 %v946_v22 }
  0x27   : > { %823 = vmatpush3.bf16.msra.mxu1 %v947_v23 }
  0x28   : > { %824 = vmatprep.subr.bf16.mxu1 %v948_v24 }
  0x2b   : > { %825 = vmatpush3.bf16.msra.mxu1 %v949_v25 }
  0x2c   : > { %826 = vmatprep.subr.bf16.mxu1 %v950_v26 }
  0x2f   : > { %827 = vmatpush3.bf16.msra.mxu1 %v951_v27 }
  0xdb   : > { %v330_v33 = vpop.f32.mrf.mxu0 }
  0xdc   : > { %v331_v40 = vadd.f32 %v330_v33, %v260_v35 }
  0xdd   : > { %v332_v36 = vpop.f32.mrf.mxu0 }
  0xde   : > { %v333_v38 = vadd.f32 %v332_v36, %v264_v34  ;;  %v347_v47 = vmax.f32 %v331_v40, 0.0 }
  0xdf   : > { %v334_v37 = vpop.f32.mrf.mxu0 }
  0xe0   : > { %v335_v39 = vadd.f32 %v334_v37, %v260_v35  ;;  %v348_v45 = vmax.f32 %v333_v38, 0.0 }
  0xe1   : > { %v336_v41 = vpop.f32.mrf.mxu0 }
  0xe2   : > { %v337_v42 = vadd.f32 %v336_v41, %v264_v34  ;;  %v349_v43 = vmax.f32 %v335_v39, 0.0 }
  0xe3   : > { %v340_v44 = vpop.f32.mrf.mxu0 }
  0xe4   : > { %v350_v46 = vmax.f32 %v337_v42, 0.0  ;;  %v353_v51 = vpack.c.bf16 %v349_v43, %v347_v47  ;;  %v341_v52 = vadd.f32 %v340_v44, %v260_v35 }
  0xe5   : > { %v342_v48 = vpop.f32.mrf.mxu0 }
  0xe6   : > { %v343_v49 = vadd.f32 %v342_v48, %v264_v34  ;;  %v354_v50 = vpack.c.bf16 %v350_v46, %v348_v45  ;;  %v351_v57 = vmax.f32 %v341_v52, 0.0 }
  0xe7   : > { %v344_v53 = vpop.f32.mrf.mxu0 }
  0xe8   : > { %v352_v54 = vmax.f32 %v343_v49, 0.0  ;;  %524 = vmatprep.mubr.bf16.mxu1 %v354_v50  ;;  %v355_v58 = vpack.c.bf16 %v351_v57, %v351_v57 }
  0xe9   : > { %v345_v55 = vpop.f32.mrf.mxu0  ;;  %525 = vmatmul.mubr.bf16.vlgmr.msra.gmra.mxu1 %v353_v51 }
  0xea   : > { %v356_v56 = vpack.c.bf16 %v352_v54, %v352_v54 }
  0xec   : > { %532 = vmatprep.mubr.bf16.mxu1 %v356_v56 }
  0xf1   : > { %533 = vmatmul.mubr.bf16.gmra.mxu1 %v355_v58 }
 0x1a9   : > { %v828_v59 = vpop.f32.mrf.mxu1 }
 0x1ab   : > { %v829_v61 = vpop.f32.mrf.mxu1 }
 0x1ac   : > { %v830_v62 = vadd.f32 %v829_v61, %v828_v59 }
 0x1ad   : > { %v831_v63 = vpop.f32.mrf.mxu1 }
 0x1ae   : > { %v527_v0 = vadd.f32 %v830_v62, %v782_v60 }
 0x1af   : > { %v832_v1 = vpop.f32.mrf.mxu1 }
 0x1b0   : > { %541 = vst.msk [vmem:[%s1178_s16] sm:$0xff] %vm540_vm2, %v527_v0  ;;  %v833_v2 = vadd.f32 %v832_v1, %v831_v63 }
 0x1b1   : > { %v834_v3 = vpop.f32.mrf.mxu1 }
 0x1b2   : > { %v530_v4 = vadd.f32 %v833_v2, %v782_v60 }
 0x1b3   : > { %v835_v5 = vpop.f32.mrf.mxu1 }
 0x1b4   : > { %542 = vst.msk [vmem:[%s1178_s16 + $0x8] sm:$0xff] %vm540_vm2, %v530_v4  ;;  %v836_v6 = vadd.f32 %v835_v5, %v834_v3  ;;  %550 = sbr.rel (!%p1100_p4) target bundleno = 494 (0x1ee), region = 44 }
 0x1b5   : > { %v837_v7 = vpop.f32.mrf.mxu1 }
 0x1b6   : > { %v535_v8 = vadd.f32 %v836_v6, %v782_v60 }
 0x1b7   : > { %v838_v9 = vpop.f32.mrf.mxu1 }
 0x1b8   : > { %543 = vst.msk [vmem:[%s1178_s16 + $0x10] sm:$0xff] %vm540_vm2, %v535_v8 }
 0x1b9   : > { %s1230_s18 = smov (!%p553_p8, %s552_s18), 3 }
 0x1ba   : > { %s799_s27 = sshll.u32 %s1230_s18, 7 }
 0x1bb   : > { %p802_p9 = scmp.eq.s32.totalorder %s799_s27, 0 }
 0x1bc   : > { %952 = sdivrem.u32 (!%p802_p9), %s1230_s18, 3 }
 0x1bd   : > { %561 = sbr.rel (%p802_p9) target bundleno = 494 (0x1ee), region = 48 }
 0x1c5   : > { %s1196_s26 = spop.drf %952 }
 0x1c6   : > { %p803_p10 = scmp.le.s32.totalorder %s1196_s26, 0 }
 0x1c7   : > { %s1012_s21 = smov (!%p803_p10), %s1190_s24   ;;  %s1016_s6 = smov (!%p803_p10), %s1178_s16  }
 0x1c8   : > { %726 = sbr.rel (%p803_p10) target bundleno = 469 (0x1d5), region = 124  ;;  %s1020_s28 = smov (!%p803_p10), 0  }
 0x1c9   : > { %s1024_s29 = smov (!%p803_p10), 0  }
 0x1cd LB: >> { %v630_v10 = vld [vmem:[%s1018_s6] sm:$0xff]  ;;  %v632_v11 = vld [vmem:[%s1018_s6 + $0x8] sm:$0xff]  ;;  %v634_v12 = vld [vmem:[%s1018_s6 + $0x10] sm:$0xff]  ;;  %s636_s30 = sadd.s32 1, %s1022_s28  ;;  %s624_s29 = sadd.s32 1, %s1026_s29   ;;  %s1026_s29 = sphi %s1024_s29, %s624_s29   ;;  %s1022_s28 = sphi %s1020_s28, %s1021_s28   ;;  %s1018_s6 = sphi %s1016_s6, %s641_s6   ;;  %s1014_s21 = sphi %s1012_s21, %s642_s21  }
 0x1ce   : >> { %631 = vst [vmem:[%s1014_s21] sm:$0xff] %v630_v10  ;;  %633 = vst [vmem:[%s1014_s21 + $0x8] sm:$0xff] %v632_v11  ;;  %p637_p11 = scmp.ge.s32.totalorder %s636_s30, %s1196_s26  ;;  %p623_p12 = scmp.ge.s32.totalorder %s624_s29, %s1196_s26 }
 0x1cf   : >> { %635 = vst [vmem:[%s1014_s21 + $0x10] sm:$0xff] %v634_v12 }
 0x1d0   : >> { %s1232_s30 = smov (%p637_p11, %s636_s30), 0  ;;  %626 = sbr.rel (!%p623_p12) target bundleno = 461 (0x1cd), region = 130 }
 0x1d1   : >> { %s639_s7 = smul.u32 24, %s1232_s30  ;;  %s1021_s28 = smov %s1232_s30  }
 0x1d3   : >> { %s641_s6 = scalar_lea.vmem %s1178_s16, %s639_s7 [#allocation2]   ;;  %s642_s21 = scalar_lea.vmem %s1190_s24, %s639_s7  }
 0x1d5 PF: > { %954 = sdivrem.u32 %s1230_s18, 3 }
 0x1d6   : > { %s804_s8 = smul.u32 24, %s1196_s26 }
 0x1d8   : > { %s647_s9 = scalar_lea.vmem %s1178_s16, %s804_s8 [#allocation2]   ;;  %s649_s10 = scalar_lea.vmem %s1190_s24, %s804_s8  }
 0x1de   : > { %s955_s11 = spop.drf %954 }
 0x1df   : > { %p806_p13 = scmp.le.s32.totalorder %s955_s11, 0 }
 0x1e0   : > { %s1028_s12 = smov (!%p806_p13), %s649_s10   ;;  %s1032_s13 = smov (!%p806_p13), %s647_s9  }
 0x1e1   : > { %740 = sbr.rel (%p806_p13) target bundleno = 494 (0x1ee), region = 135  ;;  %s1036_s14 = smov (!%p806_p13), 0  }
 0x1e2   : > { %s1040_s15 = smov (!%p806_p13), 0  }
 0x1e6 LB: >> { %v659_v13 = vld [vmem:[%s1034_s13] sm:$0xff]  ;;  %s661_s17 = sadd.s32 1, %s1038_s14  ;;  %s653_s15 = sadd.s32 1, %s1042_s15   ;;  %s1042_s15 = sphi %s1040_s15, %s653_s15   ;;  %s1038_s14 = sphi %s1036_s14, %s1037_s14   ;;  %s1034_s13 = sphi %s1032_s13, %s666_s13   ;;  %s1030_s12 = sphi %s1028_s12, %s667_s12  }
 0x1e7   : >> { %660 = vst [vmem:[%s1030_s12] sm:$0xff] %v659_v13  ;;  %p662_p0 = scmp.ge.s32.totalorder %s661_s17, %s955_s11  ;;  %p652_p1 = scmp.ge.s32.totalorder %s653_s15, %s955_s11 }
 0x1e9   : >> { %s1234_s17 = smov (%p662_p0, %s661_s17), 0  ;;  %655 = sbr.rel (!%p652_p1) target bundleno = 486 (0x1e6), region = 141 }
 0x1ea   : >> { %s807_s16 = sshll.u32 %s1234_s17, 3  ;;  %s1037_s14 = smov %s1234_s17  }
 0x1eb   : >> { %s666_s13 = scalar_lea.vmem %s647_s9, %s807_s16 [#allocation2]   ;;  %s667_s12 = scalar_lea.vmem %s649_s10, %s807_s16  }
 0x1ee PF: > { %p12_p2 = scmp.ge.s32.totalorder %s1090_s22, 4   ;;  %s1226_s18 = smov %s1006_s19 }
 0x1ef   : > { %s1227_s19 = smov %s1098_s25  ;;  %s1228_s20 = smov %s1090_s22 }
 0x1f0   :  { %14 = sbr.rel (!%p12_p2) target bundleno = 2 (0x2), region = 152 }

</bundles_post_ra>
